<compile_context>
chip_gen: v7x
topology: tpu7x:2x2x1
jax: 0.10.0
libtpu: 0.0.40
codegen_flags: <defaults>
</compile_context>

<pallas_src>
import jax
import jax.numpy as jnp
from jax.experimental import pallas as pl
from jax.experimental.pallas import tpu as pltpu


def add_kernel(a_ref, b_ref, o_ref):
    # Elementwise add on the whole VMEM tile (VPU).
    o_ref[...] = a_ref[...] + b_ref[...]


def _round_up(x, m):
    return -(-x // m) * m


def _tensorcores_per_chip():
    # v7x has 2 TensorCores per chip (megacore); v5e/v6e have 1.
    try:
        kind = jax.devices()[0].device_kind.lower()
    except Exception:
        return 1
    return 2 if "v7" in kind else 1


def _pallas_add_2d(a2, b2, block_shape, grid):
    itemsize = jnp.dtype(a2.dtype).itemsize
    block_bytes = block_shape[0] * block_shape[1] * itemsize
    # 3 operands (2 in + 1 out) x 2 pipeline buffers, plus small headroom.
    vmem_needed = 3 * 2 * block_bytes + (1 << 20)
    vmem_limit = max(2 << 20, min(32 << 20, vmem_needed))

    total = a2.size
    cost = pl.CostEstimate(
        flops=total,
        bytes_accessed=3 * total * itemsize,
        transcendentals=0,
    )

    index_map = lambda i: (i, 0)
    return pl.pallas_call(
        add_kernel,
        out_shape=jax.ShapeDtypeStruct(a2.shape, a2.dtype),
        grid_spec=pltpu.PrefetchScalarGridSpec(
            num_scalar_prefetch=0,
            grid=grid,
            in_specs=[
                pl.BlockSpec(block_shape, index_map),
                pl.BlockSpec(block_shape, index_map),
            ],
            out_specs=pl.BlockSpec(block_shape, index_map),
        ),
        compiler_params=pltpu.CompilerParams(
            dimension_semantics=("parallel",),
            vmem_limit_bytes=vmem_limit,
        ),
        cost_estimate=cost,
    )(a2, b2)


def pallas_add(x204, x194):
    assert x204.shape == x194.shape and x204.dtype == x194.dtype
    orig_shape = x204.shape
    total = x204.size
    itemsize = jnp.dtype(x204.dtype).itemsize

    lane = 128
    # Sublane minimum per dtype: 8 (f32), 16 (bf16/f16), 32 (int8/fp8).
    sub = max(8, 32 // itemsize)

    if total % lane != 0:
        # Ragged total (never hit by this module's (1, 768, 14, 14) shape).
        # A (1, total) Pallas view would populate only 1 of 8 sublanes per
        # vreg, so just let XLA fuse the add for these sizes.
        # TODO(synk): dense-prefix Pallas path + scalar tail if ever needed.
        return x204 + x194

    # Lane-dense (rows, 128) slab: free reshape, no padding, no slice.
    rows = total // lane
    a2 = x204.reshape(rows, lane)
    b2 = x194.reshape(rows, lane)

    n_tc = _tensorcores_per_chip()
    if n_tc >= 2 and rows >= 4 * sub:
        # v7x megacore: 4 even blocks -> 2 pipelined steps per TensorCore
        # (keeps intra-core DMA/compute overlap); do not over-split, each
        # grid step costs ~0.35 us of fixed overhead.
        block_rows = _round_up(pl.cdiv(rows, 4), sub)
    else:
        # Single-TC chips (v5e/v6e): one full-slab block. The whole kernel is
        # ~0.6 MiB per operand of DMA, so extra grid steps are pure overhead.
        block_rows = rows

    grid = (pl.cdiv(rows, block_rows),)
    out2 = _pallas_add_2d(a2, b2, (block_rows, lane), grid)
    return out2.reshape(orig_shape)


if __name__ == "__main__":
    key = jax.random.PRNGKey(0)
    k1, k2 = jax.random.split(key)
    # Shapes from the original module's forward: (1, 768, 14, 14) NCHW add.
    shape = (1, 768, 14, 14)
    x204 = jax.random.normal(k1, shape, dtype=jnp.float32)
    x194 = jax.random.normal(k2, shape, dtype=jnp.float32)

    # Reference computed first (plain JAX).
    ref = x204 + x194

    out = pallas_add(x204, x194)
    out = jax.block_until_ready(out)

    assert out.shape == ref.shape
    assert jnp.allclose(out, ref, atol=1e-6, rtol=1e-6)
    print("KERNEL_OK")
</pallas_src>

<mosaic_0001>
module attributes {stable_mosaic.version = 11 : i64} {
  func.func @add_kernel(%arg0: i32, %arg1: memref<1176x128xf32, #tpu.memory_space<vmem>>, %arg2: memref<1176x128xf32, #tpu.memory_space<vmem>>, %arg3: memref<1176x128xf32, #tpu.memory_space<vmem>>) attributes {dimension_semantics = [#tpu.dimension_semantics<parallel>], iteration_bounds = array<i64: 1>, scalar_prefetch = 0 : i64, scratch_operands = 0 : i64, tpu.core_type = #tpu.core_type<tc>, window_params = [{transform_indices = @transform_0, window_bounds = array<i64: 1176, 128>}, {transform_indices = @transform_1, window_bounds = array<i64: 1176, 128>}, {transform_indices = @transform_2, window_bounds = array<i64: 1176, 128>}]} {
    %c0 = arith.constant 0 : index
    %c0_0 = arith.constant 0 : index
    %0 = vector.load %arg1[%c0, %c0_0] : memref<1176x128xf32, #tpu.memory_space<vmem>>, vector<1176x128xf32>
    %c0_1 = arith.constant 0 : index
    %c0_2 = arith.constant 0 : index
    %1 = vector.load %arg2[%c0_1, %c0_2] : memref<1176x128xf32, #tpu.memory_space<vmem>>, vector<1176x128xf32>
    %2 = arith.addf %0, %1 : vector<1176x128xf32>
    %c0_3 = arith.constant 0 : index
    %c0_4 = arith.constant 0 : index
    %3 = vector.load %arg3[%c0_3, %c0_4] : memref<1176x128xf32, #tpu.memory_space<vmem>>, vector<1176x128xf32>
    tpu.vector_store %arg3[%c0_3, %c0_4], %2 {strides = array<i32>} : memref<1176x128xf32, #tpu.memory_space<vmem>>, vector<1176x128xf32>,
    return
  }
  func.func @transform_0(%arg0: i32) -> (i32, i32) {
    %c0_i32 = arith.constant 0 : i32
    %c0_i32_0 = arith.constant 0 : i32
    return %arg0, %c0_i32 : i32, i32
  }
  func.func @transform_1(%arg0: i32) -> (i32, i32) {
    %c0_i32 = arith.constant 0 : i32
    %c0_i32_0 = arith.constant 0 : i32
    return %arg0, %c0_i32 : i32, i32
  }
  func.func @transform_2(%arg0: i32) -> (i32, i32) {
    %c0_i32 = arith.constant 0 : i32
    %c0_i32_0 = arith.constant 0 : i32
    return %arg0, %c0_i32 : i32, i32
  }
}

</mosaic_0001>

<bundles_post_ra>
// kernel: tpu_custom_call.1
= control target key start
LH: loop header
LB: loop body
LE: loop exit
PB: predicated region body
PF: predicated region fallthrough
CT: control target
= control target key end

     0   :  { %7 = vsyncpa [#allocation3], 0  ;;  %s788_s0 = inlined_call_operand.hbm [shape: f32[1176,128], index: 0, kind: input, shape index: {}]   ;;  %s789_s1 = inlined_call_operand.hbm [shape: f32[1176,128], index: 1, kind: input, shape index: {}]   ;;  %s790_s2 = inlined_call_operand.hbm [shape: f32[1176,128], index: 2, kind: output, shape index: {}]  }
   0x1   :  { %8 = vsyncpa [#allocation6], 0 }
   0x2   :  { %9 = vsyncpa [#allocation4], 0  ;;  %s723_s9 = smov [#allocation2]   ;;  %s651_s13 = scalar_lea.hbm %s788_s0, 18816 }
   0x3   :  { %s15_s10 = sshll.u32 %s723_s9, 4  ;;  %p652_p0 = scmp.ne.s32.totalorder %s788_s0, %s651_s13  ;;  %s16_s10 = int_to_ptr.vmem [resolvable:$true] %s15_s10 }
   0x4   :  { %p655_p1 = scmp.lt.u32.totalorder %s651_s13, %s788_s0 }
   0x6   :  { %p657_p2 = pnand %p655_p1, %p652_p0 }
   0x8   :  { %660 = shalt.err (!%p657_p2)
}
   0x9   :  { %s661_s18 = scalar_lea.vmem %s16_s10, 18816  ;;  %p666_p4 = scmp.lt.s32.totalorder %s16_s10, %s16_s10 }
   0xa   :  { %p662_p3 = scmp.ne.s32.totalorder %s16_s10, %s661_s18  ;;  %p667_p5 = scmp.lt.s32.totalorder %s661_s18, %s661_s18 }
   0xc   :  { %p668_p6 = por %p667_p5, %p666_p4 }
   0xe   :  { %p669_p7 = pnand %p668_p6, %p662_p3 }
  0x10   :  { %672 = shalt.err (!%p669_p7)
}
  0x11   :  { %s724_s19 = smov 128   ;;  %s725_s20 = smov 8  }
  0x12   :  { %21 = dma.hbm_to_vmem [thread:$0]  %s788_s0, 18816, %s16_s10, [#allocation3], %s724_s19, %s724_s19, %s725_s20  }
  0x13   :  { %s726_s23 = smov [#allocation5]   ;;  %s673_s27 = scalar_lea.hbm %s789_s1, 18816 }
  0x14   :  { %s27_s24 = sshll.u32 %s726_s23, 4  ;;  %p674_p8 = scmp.ne.s32.totalorder %s789_s1, %s673_s27  ;;  %s28_s24 = int_to_ptr.vmem [resolvable:$true] %s27_s24 }
  0x15   :  { %p677_p9 = scmp.lt.u32.totalorder %s673_s27, %s789_s1 }
  0x17   :  { %p679_p10 = pnand %p677_p9, %p674_p8 }
  0x19   :  { %682 = shalt.err (!%p679_p10)
}
  0x1a   :  { %s683_s4 = scalar_lea.vmem %s28_s24, 18816  ;;  %p688_p12 = scmp.lt.s32.totalorder %s28_s24, %s28_s24 }
  0x1b   :  { %p684_p11 = scmp.ne.s32.totalorder %s28_s24, %s683_s4  ;;  %p689_p13 = scmp.lt.s32.totalorder %s683_s4, %s683_s4 }
  0x1d   :  { %p690_p0 = por %p689_p13, %p688_p12 }
  0x1f   :  { %p691_p1 = pnand %p690_p0, %p684_p11 }
  0x21   :  { %694 = shalt.err (!%p691_p1)
}
  0x22   :  { %33 = dma.hbm_to_vmem [thread:$0]  %s789_s1, 18816, %s28_s24, [#allocation6], %s724_s19, %s724_s19, %s725_s20  }
  0x23   :  { %717 = dma.done.wait [#allocation3], 18816  }
  0x24   :  { %718 = vsyncadd [#allocation3], 4294948480 }
  0x25   :  { %719 = dma.done.wait [#allocation6], 18816  }
  0x26   :  { %720 = vsyncadd [#allocation6], 4294948480  ;;  %v40_v0 = vld [vmem:[#allocation2] sm:$0xff]  ;;  %v187_v1 = vld [vmem:[#allocation5] sm:$0xff]  ;;  %s727_s1 = smov [#allocation7]  }
  0x27   :  { %v41_v2 = vld [vmem:[#allocation2 + $0x8] sm:$0xff]  ;;  %v334_v3 = vadd.f32 %v187_v1, %v40_v0  ;;  %v188_v4 = vld [vmem:[#allocation5 + $0x8] sm:$0xff]  ;;  %v42_v5 = vld [vmem:[#allocation2 + $0x10] sm:$0xff]  ;;  %s633_s6 = sshll.u32 %s727_s1, 4  ;;  %s634_s6 = int_to_ptr.vmem [resolvable:$true] %s633_s6 }
  0x28   :  { %v189_v6 = vld [vmem:[#allocation5 + $0x10] sm:$0xff]  ;;  %v335_v7 = vadd.f32 %v188_v4, %v41_v2  ;;  %v43_v9 = vld [vmem:[#allocation2 + $0x18] sm:$0xff]  ;;  %v190_v10 = vld [vmem:[#allocation5 + $0x18] sm:$0xff]  ;;  %s695_s7 = scalar_lea.vmem %s634_s6, 18816  ;;  %p700_p3 = scmp.lt.s32.totalorder %s634_s6, %s634_s6 }
  0x29   :  { %v336_v8 = vadd.f32 %v189_v6, %v42_v5  ;;  %v44_v11 = vld [vmem:[#allocation2 + $0x20] sm:$0xff]  ;;  %481 = vst [vmem:[#allocation7] sm:$0xff] %v334_v3  ;;  %v337_v12 = vadd.f32 %v190_v10, %v43_v9  ;;  %v191_v13 = vld [vmem:[#allocation5 + $0x20] sm:$0xff]  ;;  %v45_v14 = vld [vmem:[#allocation2 + $0x28] sm:$0xff]  ;;  %p696_p2 = scmp.ne.s32.totalorder %s634_s6, %s695_s7  ;;  %p701_p4 = scmp.lt.s32.totalorder %s695_s7, %s695_s7 }
  0x2a   :  { %v192_v15 = vld [vmem:[#allocation5 + $0x28] sm:$0xff]  ;;  %482 = vst [vmem:[#allocation7 + $0x8] sm:$0xff] %v335_v7  ;;  %v338_v16 = vadd.f32 %v191_v13, %v44_v11  ;;  %v46_v18 = vld [vmem:[#allocation2 + $0x30] sm:$0xff]  ;;  %v193_v19 = vld [vmem:[#allocation5 + $0x30] sm:$0xff] }
  0x2b   :  { %483 = vst [vmem:[#allocation7 + $0x10] sm:$0xff] %v336_v8  ;;  %v339_v17 = vadd.f32 %v192_v15, %v45_v14  ;;  %v47_v20 = vld [vmem:[#allocation2 + $0x38] sm:$0xff]  ;;  %484 = vst [vmem:[#allocation7 + $0x18] sm:$0xff] %v337_v12  ;;  %v340_v21 = vadd.f32 %v193_v19, %v46_v18  ;;  %v194_v22 = vld [vmem:[#allocation5 + $0x38] sm:$0xff]  ;;  %p702_p5 = por %p701_p4, %p700_p3 }
  0x2c   :  { %v48_v23 = vld [vmem:[#allocation2 + $0x40] sm:$0xff]  ;;  %v195_v24 = vld [vmem:[#allocation5 + $0x40] sm:$0xff]  ;;  %485 = vst [vmem:[#allocation7 + $0x20] sm:$0xff] %v338_v16  ;;  %v341_v25 = vadd.f32 %v194_v22, %v47_v20  ;;  %v49_v27 = vld [vmem:[#allocation2 + $0x48] sm:$0xff] }
  0x2d   :  { %486 = vst [vmem:[#allocation7 + $0x28] sm:$0xff] %v339_v17  ;;  %v342_v26 = vadd.f32 %v195_v24, %v48_v23  ;;  %v196_v28 = vld [vmem:[#allocation5 + $0x48] sm:$0xff]  ;;  %v50_v29 = vld [vmem:[#allocation2 + $0x50] sm:$0xff]  ;;  %487 = vst [vmem:[#allocation7 + $0x30] sm:$0xff] %v340_v21  ;;  %p703_p6 = pnand %p702_p5, %p696_p2 }
  0x2e   :  { %v343_v30 = vadd.f32 %v196_v28, %v49_v27  ;;  %v197_v31 = vld [vmem:[#allocation5 + $0x50] sm:$0xff]  ;;  %v51_v32 = vld [vmem:[#allocation2 + $0x58] sm:$0xff]  ;;  %v198_v33 = vld [vmem:[#allocation5 + $0x58] sm:$0xff]  ;;  %488 = vst [vmem:[#allocation7 + $0x38] sm:$0xff] %v341_v25 }
  0x2f   :  { %489 = vst [vmem:[#allocation7 + $0x40] sm:$0xff] %v342_v26  ;;  %v344_v34 = vadd.f32 %v197_v31, %v50_v29  ;;  %v345_v35 = vadd.f32 %v198_v33, %v51_v32  ;;  %v52_v36 = vld [vmem:[#allocation2 + $0x60] sm:$0xff]  ;;  %v199_v37 = vld [vmem:[#allocation5 + $0x60] sm:$0xff]  ;;  %v53_v38 = vld [vmem:[#allocation2 + $0x68] sm:$0xff] }
  0x30   :  { %490 = vst [vmem:[#allocation7 + $0x48] sm:$0xff] %v343_v30  ;;  %v346_v39 = vadd.f32 %v199_v37, %v52_v36  ;;  %v200_v40 = vld [vmem:[#allocation5 + $0x68] sm:$0xff]  ;;  %v54_v41 = vld [vmem:[#allocation2 + $0x70] sm:$0xff]  ;;  %v201_v42 = vld [vmem:[#allocation5 + $0x70] sm:$0xff] }
  0x31   :  { %491 = vst [vmem:[#allocation7 + $0x50] sm:$0xff] %v344_v34  ;;  %492 = vst [vmem:[#allocation7 + $0x58] sm:$0xff] %v345_v35  ;;  %v347_v43 = vadd.f32 %v200_v40, %v53_v38  ;;  %v348_v44 = vadd.f32 %v201_v42, %v54_v41  ;;  %v55_v45 = vld [vmem:[#allocation2 + $0x78] sm:$0xff]  ;;  %v202_v46 = vld [vmem:[#allocation5 + $0x78] sm:$0xff] }
  0x32   :  { %v56_v47 = vld [vmem:[#allocation2 + $0x80] sm:$0xff]  ;;  %493 = vst [vmem:[#allocation7 + $0x60] sm:$0xff] %v346_v39  ;;  %v349_v48 = vadd.f32 %v202_v46, %v55_v45  ;;  %v203_v49 = vld [vmem:[#allocation5 + $0x80] sm:$0xff]  ;;  %v57_v50 = vld [vmem:[#allocation2 + $0x88] sm:$0xff] }
  0x33   :  { %v204_v51 = vld [vmem:[#allocation5 + $0x88] sm:$0xff]  ;;  %494 = vst [vmem:[#allocation7 + $0x68] sm:$0xff] %v347_v43  ;;  %495 = vst [vmem:[#allocation7 + $0x70] sm:$0xff] %v348_v44  ;;  %v350_v52 = vadd.f32 %v203_v49, %v56_v47  ;;  %v58_v54 = vld [vmem:[#allocation2 + $0x90] sm:$0xff] }
  0x34   :  { %v351_v53 = vadd.f32 %v204_v51, %v57_v50  ;;  %v205_v55 = vld [vmem:[#allocation5 + $0x90] sm:$0xff]  ;;  %v59_v56 = vld [vmem:[#allocation2 + $0x98] sm:$0xff]  ;;  %496 = vst [vmem:[#allocation7 + $0x78] sm:$0xff] %v349_v48  ;;  %v206_v58 = vld [vmem:[#allocation5 + $0x98] sm:$0xff] }
  0x35   :  { %v352_v57 = vadd.f32 %v205_v55, %v58_v54  ;;  %v60_v59 = vld [vmem:[#allocation2 + $0xa0] sm:$0xff]  ;;  %v207_v60 = vld [vmem:[#allocation5 + $0xa0] sm:$0xff]  ;;  %497 = vst [vmem:[#allocation7 + $0x80] sm:$0xff] %v350_v52  ;;  %v353_v61 = vadd.f32 %v206_v58, %v59_v56  ;;  %v61_v63 = vld [vmem:[#allocation2 + $0xa8] sm:$0xff] }
  0x36   :  { %498 = vst [vmem:[#allocation7 + $0x88] sm:$0xff] %v351_v53  ;;  %v354_v62 = vadd.f32 %v207_v60, %v60_v59  ;;  %v208_v0 = vld [vmem:[#allocation5 + $0xa8] sm:$0xff]  ;;  %v62_v1 = vld [vmem:[#allocation2 + $0xb0] sm:$0xff]  ;;  %v209_v3 = vld [vmem:[#allocation5 + $0xb0] sm:$0xff] }
  0x37   :  { %499 = vst [vmem:[#allocation7 + $0x90] sm:$0xff] %v352_v57  ;;  %v355_v2 = vadd.f32 %v208_v0, %v61_v63  ;;  %v63_v4 = vld [vmem:[#allocation2 + $0xb8] sm:$0xff]  ;;  %v210_v5 = vld [vmem:[#allocation5 + $0xb8] sm:$0xff]  ;;  %500 = vst [vmem:[#allocation7 + $0x98] sm:$0xff] %v353_v61  ;;  %v356_v6 = vadd.f32 %v209_v3, %v62_v1 }
  0x38   :  { %501 = vst [vmem:[#allocation7 + $0xa0] sm:$0xff] %v354_v62  ;;  %v357_v7 = vadd.f32 %v210_v5, %v63_v4  ;;  %v64_v8 = vld [vmem:[#allocation2 + $0xc0] sm:$0xff]  ;;  %v211_v9 = vld [vmem:[#allocation5 + $0xc0] sm:$0xff]  ;;  %v65_v10 = vld [vmem:[#allocation2 + $0xc8] sm:$0xff] }
  0x39   :  { %502 = vst [vmem:[#allocation7 + $0xa8] sm:$0xff] %v355_v2  ;;  %v358_v11 = vadd.f32 %v211_v9, %v64_v8  ;;  %v212_v12 = vld [vmem:[#allocation5 + $0xc8] sm:$0xff]  ;;  %v66_v13 = vld [vmem:[#allocation2 + $0xd0] sm:$0xff]  ;;  %v213_v14 = vld [vmem:[#allocation5 + $0xd0] sm:$0xff] }
  0x3a   :  { %503 = vst [vmem:[#allocation7 + $0xb0] sm:$0xff] %v356_v6  ;;  %504 = vst [vmem:[#allocation7 + $0xb8] sm:$0xff] %v357_v7  ;;  %v359_v15 = vadd.f32 %v212_v12, %v65_v10  ;;  %v360_v16 = vadd.f32 %v213_v14, %v66_v13  ;;  %v67_v17 = vld [vmem:[#allocation2 + $0xd8] sm:$0xff]  ;;  %v214_v18 = vld [vmem:[#allocation5 + $0xd8] sm:$0xff] }
  0x3b   :  { %v68_v19 = vld [vmem:[#allocation2 + $0xe0] sm:$0xff]  ;;  %505 = vst [vmem:[#allocation7 + $0xc0] sm:$0xff] %v358_v11  ;;  %v361_v20 = vadd.f32 %v214_v18, %v67_v17  ;;  %v215_v21 = vld [vmem:[#allocation5 + $0xe0] sm:$0xff]  ;;  %v69_v22 = vld [vmem:[#allocation2 + $0xe8] sm:$0xff] }
  0x3c   :  { %v216_v23 = vld [vmem:[#allocation5 + $0xe8] sm:$0xff]  ;;  %506 = vst [vmem:[#allocation7 + $0xc8] sm:$0xff] %v359_v15  ;;  %507 = vst [vmem:[#allocation7 + $0xd0] sm:$0xff] %v360_v16  ;;  %v362_v24 = vadd.f32 %v215_v21, %v68_v19  ;;  %v70_v26 = vld [vmem:[#allocation2 + $0xf0] sm:$0xff] }
  0x3d   :  { %v363_v25 = vadd.f32 %v216_v23, %v69_v22  ;;  %v217_v27 = vld [vmem:[#allocation5 + $0xf0] sm:$0xff]  ;;  %v71_v28 = vld [vmem:[#allocation2 + $0xf8] sm:$0xff]  ;;  %508 = vst [vmem:[#allocation7 + $0xd8] sm:$0xff] %v361_v20  ;;  %v218_v30 = vld [vmem:[#allocation5 + $0xf8] sm:$0xff] }
  0x3e   :  { %v364_v29 = vadd.f32 %v217_v27, %v70_v26  ;;  %v72_v31 = vld [vmem:[#allocation2 + $0x100] sm:$0xff]  ;;  %v219_v32 = vld [vmem:[#allocation5 + $0x100] sm:$0xff]  ;;  %509 = vst [vmem:[#allocation7 + $0xe0] sm:$0xff] %v362_v24  ;;  %v365_v33 = vadd.f32 %v218_v30, %v71_v28  ;;  %v73_v35 = vld [vmem:[#allocation2 + $0x108] sm:$0xff] }
  0x3f   :  { %510 = vst [vmem:[#allocation7 + $0xe8] sm:$0xff] %v363_v25  ;;  %v366_v34 = vadd.f32 %v219_v32, %v72_v31  ;;  %v220_v36 = vld [vmem:[#allocation5 + $0x108] sm:$0xff]  ;;  %v74_v37 = vld [vmem:[#allocation2 + $0x110] sm:$0xff]  ;;  %v221_v39 = vld [vmem:[#allocation5 + $0x110] sm:$0xff] }
  0x40   :  { %511 = vst [vmem:[#allocation7 + $0xf0] sm:$0xff] %v364_v29  ;;  %v367_v38 = vadd.f32 %v220_v36, %v73_v35  ;;  %v75_v40 = vld [vmem:[#allocation2 + $0x118] sm:$0xff]  ;;  %v222_v41 = vld [vmem:[#allocation5 + $0x118] sm:$0xff]  ;;  %512 = vst [vmem:[#allocation7 + $0xf8] sm:$0xff] %v365_v33  ;;  %v368_v42 = vadd.f32 %v221_v39, %v74_v37 }
  0x41   :  { %513 = vst [vmem:[#allocation7 + $0x100] sm:$0xff] %v366_v34  ;;  %v369_v43 = vadd.f32 %v222_v41, %v75_v40  ;;  %v76_v44 = vld [vmem:[#allocation2 + $0x120] sm:$0xff]  ;;  %v223_v45 = vld [vmem:[#allocation5 + $0x120] sm:$0xff]  ;;  %v77_v46 = vld [vmem:[#allocation2 + $0x128] sm:$0xff] }
  0x42   :  { %514 = vst [vmem:[#allocation7 + $0x108] sm:$0xff] %v367_v38  ;;  %v370_v47 = vadd.f32 %v223_v45, %v76_v44  ;;  %v224_v48 = vld [vmem:[#allocation5 + $0x128] sm:$0xff]  ;;  %v78_v49 = vld [vmem:[#allocation2 + $0x130] sm:$0xff]  ;;  %v225_v50 = vld [vmem:[#allocation5 + $0x130] sm:$0xff] }
  0x43   :  { %515 = vst [vmem:[#allocation7 + $0x110] sm:$0xff] %v368_v42  ;;  %516 = vst [vmem:[#allocation7 + $0x118] sm:$0xff] %v369_v43  ;;  %v371_v51 = vadd.f32 %v224_v48, %v77_v46  ;;  %v372_v52 = vadd.f32 %v225_v50, %v78_v49  ;;  %v79_v53 = vld [vmem:[#allocation2 + $0x138] sm:$0xff]  ;;  %v226_v54 = vld [vmem:[#allocation5 + $0x138] sm:$0xff] }
  0x44   :  { %v80_v55 = vld [vmem:[#allocation2 + $0x140] sm:$0xff]  ;;  %517 = vst [vmem:[#allocation7 + $0x120] sm:$0xff] %v370_v47  ;;  %v373_v56 = vadd.f32 %v226_v54, %v79_v53  ;;  %v227_v57 = vld [vmem:[#allocation5 + $0x140] sm:$0xff]  ;;  %v81_v58 = vld [vmem:[#allocation2 + $0x148] sm:$0xff] }
  0x45   :  { %v228_v59 = vld [vmem:[#allocation5 + $0x148] sm:$0xff]  ;;  %518 = vst [vmem:[#allocation7 + $0x128] sm:$0xff] %v371_v51  ;;  %519 = vst [vmem:[#allocation7 + $0x130] sm:$0xff] %v372_v52  ;;  %v374_v60 = vadd.f32 %v227_v57, %v80_v55  ;;  %v82_v62 = vld [vmem:[#allocation2 + $0x150] sm:$0xff] }
  0x46   :  { %v375_v61 = vadd.f32 %v228_v59, %v81_v58  ;;  %v229_v63 = vld [vmem:[#allocation5 + $0x150] sm:$0xff]  ;;  %v83_v0 = vld [vmem:[#allocation2 + $0x158] sm:$0xff]  ;;  %520 = vst [vmem:[#allocation7 + $0x138] sm:$0xff] %v373_v56  ;;  %v230_v2 = vld [vmem:[#allocation5 + $0x158] sm:$0xff] }
  0x47   :  { %v376_v1 = vadd.f32 %v229_v63, %v82_v62  ;;  %v84_v3 = vld [vmem:[#allocation2 + $0x160] sm:$0xff]  ;;  %v231_v4 = vld [vmem:[#allocation5 + $0x160] sm:$0xff]  ;;  %521 = vst [vmem:[#allocation7 + $0x140] sm:$0xff] %v374_v60  ;;  %v377_v5 = vadd.f32 %v230_v2, %v83_v0  ;;  %v85_v7 = vld [vmem:[#allocation2 + $0x168] sm:$0xff] }
  0x48   :  { %522 = vst [vmem:[#allocation7 + $0x148] sm:$0xff] %v375_v61  ;;  %v378_v6 = vadd.f32 %v231_v4, %v84_v3  ;;  %v232_v8 = vld [vmem:[#allocation5 + $0x168] sm:$0xff]  ;;  %v86_v9 = vld [vmem:[#allocation2 + $0x170] sm:$0xff]  ;;  %v233_v11 = vld [vmem:[#allocation5 + $0x170] sm:$0xff] }
  0x49   :  { %523 = vst [vmem:[#allocation7 + $0x150] sm:$0xff] %v376_v1  ;;  %v379_v10 = vadd.f32 %v232_v8, %v85_v7  ;;  %v87_v12 = vld [vmem:[#allocation2 + $0x178] sm:$0xff]  ;;  %v234_v13 = vld [vmem:[#allocation5 + $0x178] sm:$0xff]  ;;  %524 = vst [vmem:[#allocation7 + $0x158] sm:$0xff] %v377_v5  ;;  %v380_v14 = vadd.f32 %v233_v11, %v86_v9 }
  0x4a   :  { %525 = vst [vmem:[#allocation7 + $0x160] sm:$0xff] %v378_v6  ;;  %v381_v15 = vadd.f32 %v234_v13, %v87_v12  ;;  %v88_v16 = vld [vmem:[#allocation2 + $0x180] sm:$0xff]  ;;  %v235_v17 = vld [vmem:[#allocation5 + $0x180] sm:$0xff]  ;;  %v89_v18 = vld [vmem:[#allocation2 + $0x188] sm:$0xff] }
  0x4b   :  { %526 = vst [vmem:[#allocation7 + $0x168] sm:$0xff] %v379_v10  ;;  %v382_v19 = vadd.f32 %v235_v17, %v88_v16  ;;  %v236_v20 = vld [vmem:[#allocation5 + $0x188] sm:$0xff]  ;;  %v90_v21 = vld [vmem:[#allocation2 + $0x190] sm:$0xff]  ;;  %v237_v22 = vld [vmem:[#allocation5 + $0x190] sm:$0xff] }
  0x4c   :  { %527 = vst [vmem:[#allocation7 + $0x170] sm:$0xff] %v380_v14  ;;  %528 = vst [vmem:[#allocation7 + $0x178] sm:$0xff] %v381_v15  ;;  %v383_v23 = vadd.f32 %v236_v20, %v89_v18  ;;  %v384_v24 = vadd.f32 %v237_v22, %v90_v21  ;;  %v91_v25 = vld [vmem:[#allocation2 + $0x198] sm:$0xff]  ;;  %v238_v26 = vld [vmem:[#allocation5 + $0x198] sm:$0xff] }
  0x4d   :  { %v92_v27 = vld [vmem:[#allocation2 + $0x1a0] sm:$0xff]  ;;  %529 = vst [vmem:[#allocation7 + $0x180] sm:$0xff] %v382_v19  ;;  %v385_v28 = vadd.f32 %v238_v26, %v91_v25  ;;  %v239_v29 = vld [vmem:[#allocation5 + $0x1a0] sm:$0xff]  ;;  %v93_v30 = vld [vmem:[#allocation2 + $0x1a8] sm:$0xff] }
  0x4e   :  { %v240_v31 = vld [vmem:[#allocation5 + $0x1a8] sm:$0xff]  ;;  %530 = vst [vmem:[#allocation7 + $0x188] sm:$0xff] %v383_v23  ;;  %531 = vst [vmem:[#allocation7 + $0x190] sm:$0xff] %v384_v24  ;;  %v386_v32 = vadd.f32 %v239_v29, %v92_v27  ;;  %v94_v34 = vld [vmem:[#allocation2 + $0x1b0] sm:$0xff] }
  0x4f   :  { %v387_v33 = vadd.f32 %v240_v31, %v93_v30  ;;  %v241_v35 = vld [vmem:[#allocation5 + $0x1b0] sm:$0xff]  ;;  %v95_v36 = vld [vmem:[#allocation2 + $0x1b8] sm:$0xff]  ;;  %532 = vst [vmem:[#allocation7 + $0x198] sm:$0xff] %v385_v28  ;;  %v242_v38 = vld [vmem:[#allocation5 + $0x1b8] sm:$0xff] }
  0x50   :  { %v388_v37 = vadd.f32 %v241_v35, %v94_v34  ;;  %v96_v39 = vld [vmem:[#allocation2 + $0x1c0] sm:$0xff]  ;;  %v243_v40 = vld [vmem:[#allocation5 + $0x1c0] sm:$0xff]  ;;  %533 = vst [vmem:[#allocation7 + $0x1a0] sm:$0xff] %v386_v32  ;;  %v389_v41 = vadd.f32 %v242_v38, %v95_v36  ;;  %v97_v43 = vld [vmem:[#allocation2 + $0x1c8] sm:$0xff] }
  0x51   :  { %534 = vst [vmem:[#allocation7 + $0x1a8] sm:$0xff] %v387_v33  ;;  %v390_v42 = vadd.f32 %v243_v40, %v96_v39  ;;  %v244_v44 = vld [vmem:[#allocation5 + $0x1c8] sm:$0xff]  ;;  %v98_v45 = vld [vmem:[#allocation2 + $0x1d0] sm:$0xff]  ;;  %v245_v47 = vld [vmem:[#allocation5 + $0x1d0] sm:$0xff] }
  0x52   :  { %535 = vst [vmem:[#allocation7 + $0x1b0] sm:$0xff] %v388_v37  ;;  %v391_v46 = vadd.f32 %v244_v44, %v97_v43  ;;  %v99_v48 = vld [vmem:[#allocation2 + $0x1d8] sm:$0xff]  ;;  %v246_v49 = vld [vmem:[#allocation5 + $0x1d8] sm:$0xff]  ;;  %536 = vst [vmem:[#allocation7 + $0x1b8] sm:$0xff] %v389_v41  ;;  %v392_v50 = vadd.f32 %v245_v47, %v98_v45 }
  0x53   :  { %537 = vst [vmem:[#allocation7 + $0x1c0] sm:$0xff] %v390_v42  ;;  %v393_v51 = vadd.f32 %v246_v49, %v99_v48  ;;  %v100_v52 = vld [vmem:[#allocation2 + $0x1e0] sm:$0xff]  ;;  %v247_v53 = vld [vmem:[#allocation5 + $0x1e0] sm:$0xff]  ;;  %v101_v54 = vld [vmem:[#allocation2 + $0x1e8] sm:$0xff] }
  0x54   :  { %538 = vst [vmem:[#allocation7 + $0x1c8] sm:$0xff] %v391_v46  ;;  %v394_v55 = vadd.f32 %v247_v53, %v100_v52  ;;  %v248_v56 = vld [vmem:[#allocation5 + $0x1e8] sm:$0xff]  ;;  %v102_v57 = vld [vmem:[#allocation2 + $0x1f0] sm:$0xff]  ;;  %v249_v58 = vld [vmem:[#allocation5 + $0x1f0] sm:$0xff] }
  0x55   :  { %539 = vst [vmem:[#allocation7 + $0x1d0] sm:$0xff] %v392_v50  ;;  %540 = vst [vmem:[#allocation7 + $0x1d8] sm:$0xff] %v393_v51  ;;  %v395_v59 = vadd.f32 %v248_v56, %v101_v54  ;;  %v396_v60 = vadd.f32 %v249_v58, %v102_v57  ;;  %v103_v61 = vld [vmem:[#allocation2 + $0x1f8] sm:$0xff]  ;;  %v250_v62 = vld [vmem:[#allocation5 + $0x1f8] sm:$0xff] }
  0x56   :  { %v104_v63 = vld [vmem:[#allocation2 + $0x200] sm:$0xff]  ;;  %541 = vst [vmem:[#allocation7 + $0x1e0] sm:$0xff] %v394_v55  ;;  %v397_v0 = vadd.f32 %v250_v62, %v103_v61  ;;  %v251_v1 = vld [vmem:[#allocation5 + $0x200] sm:$0xff]  ;;  %v105_v2 = vld [vmem:[#allocation2 + $0x208] sm:$0xff] }
  0x57   :  { %v252_v3 = vld [vmem:[#allocation5 + $0x208] sm:$0xff]  ;;  %542 = vst [vmem:[#allocation7 + $0x1e8] sm:$0xff] %v395_v59  ;;  %543 = vst [vmem:[#allocation7 + $0x1f0] sm:$0xff] %v396_v60  ;;  %v398_v4 = vadd.f32 %v251_v1, %v104_v63  ;;  %v106_v6 = vld [vmem:[#allocation2 + $0x210] sm:$0xff] }
  0x58   :  { %v399_v5 = vadd.f32 %v252_v3, %v105_v2  ;;  %v253_v7 = vld [vmem:[#allocation5 + $0x210] sm:$0xff]  ;;  %v107_v8 = vld [vmem:[#allocation2 + $0x218] sm:$0xff]  ;;  %544 = vst [vmem:[#allocation7 + $0x1f8] sm:$0xff] %v397_v0  ;;  %v254_v10 = vld [vmem:[#allocation5 + $0x218] sm:$0xff] }
  0x59   :  { %v400_v9 = vadd.f32 %v253_v7, %v106_v6  ;;  %v108_v11 = vld [vmem:[#allocation2 + $0x220] sm:$0xff]  ;;  %v255_v12 = vld [vmem:[#allocation5 + $0x220] sm:$0xff]  ;;  %545 = vst [vmem:[#allocation7 + $0x200] sm:$0xff] %v398_v4  ;;  %v401_v13 = vadd.f32 %v254_v10, %v107_v8  ;;  %v109_v15 = vld [vmem:[#allocation2 + $0x228] sm:$0xff] }
  0x5a   :  { %546 = vst [vmem:[#allocation7 + $0x208] sm:$0xff] %v399_v5  ;;  %v402_v14 = vadd.f32 %v255_v12, %v108_v11  ;;  %v256_v16 = vld [vmem:[#allocation5 + $0x228] sm:$0xff]  ;;  %v110_v17 = vld [vmem:[#allocation2 + $0x230] sm:$0xff]  ;;  %v257_v19 = vld [vmem:[#allocation5 + $0x230] sm:$0xff] }
  0x5b   :  { %547 = vst [vmem:[#allocation7 + $0x210] sm:$0xff] %v400_v9  ;;  %v403_v18 = vadd.f32 %v256_v16, %v109_v15  ;;  %v111_v20 = vld [vmem:[#allocation2 + $0x238] sm:$0xff]  ;;  %v258_v21 = vld [vmem:[#allocation5 + $0x238] sm:$0xff]  ;;  %548 = vst [vmem:[#allocation7 + $0x218] sm:$0xff] %v401_v13  ;;  %v404_v22 = vadd.f32 %v257_v19, %v110_v17 }
  0x5c   :  { %549 = vst [vmem:[#allocation7 + $0x220] sm:$0xff] %v402_v14  ;;  %v405_v23 = vadd.f32 %v258_v21, %v111_v20  ;;  %v112_v24 = vld [vmem:[#allocation2 + $0x240] sm:$0xff]  ;;  %v259_v25 = vld [vmem:[#allocation5 + $0x240] sm:$0xff]  ;;  %v113_v26 = vld [vmem:[#allocation2 + $0x248] sm:$0xff] }
  0x5d   :  { %550 = vst [vmem:[#allocation7 + $0x228] sm:$0xff] %v403_v18  ;;  %v406_v27 = vadd.f32 %v259_v25, %v112_v24  ;;  %v260_v28 = vld [vmem:[#allocation5 + $0x248] sm:$0xff]  ;;  %v114_v29 = vld [vmem:[#allocation2 + $0x250] sm:$0xff]  ;;  %v261_v30 = vld [vmem:[#allocation5 + $0x250] sm:$0xff] }
  0x5e   :  { %551 = vst [vmem:[#allocation7 + $0x230] sm:$0xff] %v404_v22  ;;  %552 = vst [vmem:[#allocation7 + $0x238] sm:$0xff] %v405_v23  ;;  %v407_v31 = vadd.f32 %v260_v28, %v113_v26  ;;  %v408_v32 = vadd.f32 %v261_v30, %v114_v29  ;;  %v115_v33 = vld [vmem:[#allocation2 + $0x258] sm:$0xff]  ;;  %v262_v34 = vld [vmem:[#allocation5 + $0x258] sm:$0xff] }
  0x5f   :  { %v116_v35 = vld [vmem:[#allocation2 + $0x260] sm:$0xff]  ;;  %553 = vst [vmem:[#allocation7 + $0x240] sm:$0xff] %v406_v27  ;;  %v409_v36 = vadd.f32 %v262_v34, %v115_v33  ;;  %v263_v37 = vld [vmem:[#allocation5 + $0x260] sm:$0xff]  ;;  %v117_v38 = vld [vmem:[#allocation2 + $0x268] sm:$0xff] }
  0x60   :  { %v264_v39 = vld [vmem:[#allocation5 + $0x268] sm:$0xff]  ;;  %554 = vst [vmem:[#allocation7 + $0x248] sm:$0xff] %v407_v31  ;;  %555 = vst [vmem:[#allocation7 + $0x250] sm:$0xff] %v408_v32  ;;  %v410_v40 = vadd.f32 %v263_v37, %v116_v35  ;;  %v118_v42 = vld [vmem:[#allocation2 + $0x270] sm:$0xff] }
  0x61   :  { %v411_v41 = vadd.f32 %v264_v39, %v117_v38  ;;  %v265_v43 = vld [vmem:[#allocation5 + $0x270] sm:$0xff]  ;;  %v119_v44 = vld [vmem:[#allocation2 + $0x278] sm:$0xff]  ;;  %556 = vst [vmem:[#allocation7 + $0x258] sm:$0xff] %v409_v36  ;;  %v266_v46 = vld [vmem:[#allocation5 + $0x278] sm:$0xff] }
  0x62   :  { %v412_v45 = vadd.f32 %v265_v43, %v118_v42  ;;  %v120_v47 = vld [vmem:[#allocation2 + $0x280] sm:$0xff]  ;;  %v267_v48 = vld [vmem:[#allocation5 + $0x280] sm:$0xff]  ;;  %557 = vst [vmem:[#allocation7 + $0x260] sm:$0xff] %v410_v40  ;;  %v413_v49 = vadd.f32 %v266_v46, %v119_v44  ;;  %v121_v51 = vld [vmem:[#allocation2 + $0x288] sm:$0xff] }
  0x63   :  { %558 = vst [vmem:[#allocation7 + $0x268] sm:$0xff] %v411_v41  ;;  %v414_v50 = vadd.f32 %v267_v48, %v120_v47  ;;  %v268_v52 = vld [vmem:[#allocation5 + $0x288] sm:$0xff]  ;;  %v122_v53 = vld [vmem:[#allocation2 + $0x290] sm:$0xff]  ;;  %v269_v55 = vld [vmem:[#allocation5 + $0x290] sm:$0xff] }
  0x64   :  { %559 = vst [vmem:[#allocation7 + $0x270] sm:$0xff] %v412_v45  ;;  %v415_v54 = vadd.f32 %v268_v52, %v121_v51  ;;  %v123_v56 = vld [vmem:[#allocation2 + $0x298] sm:$0xff]  ;;  %v270_v57 = vld [vmem:[#allocation5 + $0x298] sm:$0xff]  ;;  %560 = vst [vmem:[#allocation7 + $0x278] sm:$0xff] %v413_v49  ;;  %v416_v58 = vadd.f32 %v269_v55, %v122_v53 }
  0x65   :  { %561 = vst [vmem:[#allocation7 + $0x280] sm:$0xff] %v414_v50  ;;  %v417_v59 = vadd.f32 %v270_v57, %v123_v56  ;;  %v124_v60 = vld [vmem:[#allocation2 + $0x2a0] sm:$0xff]  ;;  %v271_v61 = vld [vmem:[#allocation5 + $0x2a0] sm:$0xff]  ;;  %v125_v62 = vld [vmem:[#allocation2 + $0x2a8] sm:$0xff] }
  0x66   :  { %562 = vst [vmem:[#allocation7 + $0x288] sm:$0xff] %v415_v54  ;;  %v418_v63 = vadd.f32 %v271_v61, %v124_v60  ;;  %v272_v0 = vld [vmem:[#allocation5 + $0x2a8] sm:$0xff]  ;;  %v126_v1 = vld [vmem:[#allocation2 + $0x2b0] sm:$0xff]  ;;  %v273_v2 = vld [vmem:[#allocation5 + $0x2b0] sm:$0xff] }
  0x67   :  { %563 = vst [vmem:[#allocation7 + $0x290] sm:$0xff] %v416_v58  ;;  %564 = vst [vmem:[#allocation7 + $0x298] sm:$0xff] %v417_v59  ;;  %v419_v3 = vadd.f32 %v272_v0, %v125_v62  ;;  %v420_v4 = vadd.f32 %v273_v2, %v126_v1  ;;  %v127_v5 = vld [vmem:[#allocation2 + $0x2b8] sm:$0xff]  ;;  %v274_v6 = vld [vmem:[#allocation5 + $0x2b8] sm:$0xff] }
  0x68   :  { %v128_v7 = vld [vmem:[#allocation2 + $0x2c0] sm:$0xff]  ;;  %565 = vst [vmem:[#allocation7 + $0x2a0] sm:$0xff] %v418_v63  ;;  %v421_v8 = vadd.f32 %v274_v6, %v127_v5  ;;  %v275_v9 = vld [vmem:[#allocation5 + $0x2c0] sm:$0xff]  ;;  %v129_v10 = vld [vmem:[#allocation2 + $0x2c8] sm:$0xff] }
  0x69   :  { %v276_v11 = vld [vmem:[#allocation5 + $0x2c8] sm:$0xff]  ;;  %566 = vst [vmem:[#allocation7 + $0x2a8] sm:$0xff] %v419_v3  ;;  %567 = vst [vmem:[#allocation7 + $0x2b0] sm:$0xff] %v420_v4  ;;  %v422_v12 = vadd.f32 %v275_v9, %v128_v7  ;;  %v130_v14 = vld [vmem:[#allocation2 + $0x2d0] sm:$0xff] }
  0x6a   :  { %v423_v13 = vadd.f32 %v276_v11, %v129_v10  ;;  %v277_v15 = vld [vmem:[#allocation5 + $0x2d0] sm:$0xff]  ;;  %v131_v16 = vld [vmem:[#allocation2 + $0x2d8] sm:$0xff]  ;;  %568 = vst [vmem:[#allocation7 + $0x2b8] sm:$0xff] %v421_v8  ;;  %v278_v18 = vld [vmem:[#allocation5 + $0x2d8] sm:$0xff] }
  0x6b   :  { %v424_v17 = vadd.f32 %v277_v15, %v130_v14  ;;  %v132_v19 = vld [vmem:[#allocation2 + $0x2e0] sm:$0xff]  ;;  %v279_v20 = vld [vmem:[#allocation5 + $0x2e0] sm:$0xff]  ;;  %569 = vst [vmem:[#allocation7 + $0x2c0] sm:$0xff] %v422_v12  ;;  %v425_v21 = vadd.f32 %v278_v18, %v131_v16  ;;  %v133_v23 = vld [vmem:[#allocation2 + $0x2e8] sm:$0xff] }
  0x6c   :  { %570 = vst [vmem:[#allocation7 + $0x2c8] sm:$0xff] %v423_v13  ;;  %v426_v22 = vadd.f32 %v279_v20, %v132_v19  ;;  %v280_v24 = vld [vmem:[#allocation5 + $0x2e8] sm:$0xff]  ;;  %v134_v25 = vld [vmem:[#allocation2 + $0x2f0] sm:$0xff]  ;;  %v281_v27 = vld [vmem:[#allocation5 + $0x2f0] sm:$0xff] }
  0x6d   :  { %571 = vst [vmem:[#allocation7 + $0x2d0] sm:$0xff] %v424_v17  ;;  %v427_v26 = vadd.f32 %v280_v24, %v133_v23  ;;  %v135_v28 = vld [vmem:[#allocation2 + $0x2f8] sm:$0xff]  ;;  %v282_v29 = vld [vmem:[#allocation5 + $0x2f8] sm:$0xff]  ;;  %572 = vst [vmem:[#allocation7 + $0x2d8] sm:$0xff] %v425_v21  ;;  %v428_v30 = vadd.f32 %v281_v27, %v134_v25 }
  0x6e   :  { %573 = vst [vmem:[#allocation7 + $0x2e0] sm:$0xff] %v426_v22  ;;  %v429_v31 = vadd.f32 %v282_v29, %v135_v28  ;;  %v136_v32 = vld [vmem:[#allocation2 + $0x300] sm:$0xff]  ;;  %v283_v33 = vld [vmem:[#allocation5 + $0x300] sm:$0xff]  ;;  %v137_v34 = vld [vmem:[#allocation2 + $0x308] sm:$0xff] }
  0x6f   :  { %574 = vst [vmem:[#allocation7 + $0x2e8] sm:$0xff] %v427_v26  ;;  %v430_v35 = vadd.f32 %v283_v33, %v136_v32  ;;  %v284_v36 = vld [vmem:[#allocation5 + $0x308] sm:$0xff]  ;;  %v138_v37 = vld [vmem:[#allocation2 + $0x310] sm:$0xff]  ;;  %v285_v38 = vld [vmem:[#allocation5 + $0x310] sm:$0xff] }
  0x70   :  { %575 = vst [vmem:[#allocation7 + $0x2f0] sm:$0xff] %v428_v30  ;;  %576 = vst [vmem:[#allocation7 + $0x2f8] sm:$0xff] %v429_v31  ;;  %v431_v39 = vadd.f32 %v284_v36, %v137_v34  ;;  %v432_v40 = vadd.f32 %v285_v38, %v138_v37  ;;  %v139_v41 = vld [vmem:[#allocation2 + $0x318] sm:$0xff]  ;;  %v286_v42 = vld [vmem:[#allocation5 + $0x318] sm:$0xff] }
  0x71   :  { %v140_v43 = vld [vmem:[#allocation2 + $0x320] sm:$0xff]  ;;  %577 = vst [vmem:[#allocation7 + $0x300] sm:$0xff] %v430_v35  ;;  %v433_v44 = vadd.f32 %v286_v42, %v139_v41  ;;  %v287_v45 = vld [vmem:[#allocation5 + $0x320] sm:$0xff]  ;;  %v141_v46 = vld [vmem:[#allocation2 + $0x328] sm:$0xff] }
  0x72   :  { %v288_v47 = vld [vmem:[#allocation5 + $0x328] sm:$0xff]  ;;  %578 = vst [vmem:[#allocation7 + $0x308] sm:$0xff] %v431_v39  ;;  %579 = vst [vmem:[#allocation7 + $0x310] sm:$0xff] %v432_v40  ;;  %v434_v48 = vadd.f32 %v287_v45, %v140_v43  ;;  %v142_v50 = vld [vmem:[#allocation2 + $0x330] sm:$0xff] }
  0x73   :  { %v435_v49 = vadd.f32 %v288_v47, %v141_v46  ;;  %v289_v51 = vld [vmem:[#allocation5 + $0x330] sm:$0xff]  ;;  %v143_v52 = vld [vmem:[#allocation2 + $0x338] sm:$0xff]  ;;  %580 = vst [vmem:[#allocation7 + $0x318] sm:$0xff] %v433_v44  ;;  %v290_v54 = vld [vmem:[#allocation5 + $0x338] sm:$0xff] }
  0x74   :  { %v436_v53 = vadd.f32 %v289_v51, %v142_v50  ;;  %v144_v55 = vld [vmem:[#allocation2 + $0x340] sm:$0xff]  ;;  %v291_v56 = vld [vmem:[#allocation5 + $0x340] sm:$0xff]  ;;  %581 = vst [vmem:[#allocation7 + $0x320] sm:$0xff] %v434_v48  ;;  %v437_v57 = vadd.f32 %v290_v54, %v143_v52  ;;  %v145_v59 = vld [vmem:[#allocation2 + $0x348] sm:$0xff] }
  0x75   :  { %582 = vst [vmem:[#allocation7 + $0x328] sm:$0xff] %v435_v49  ;;  %v438_v58 = vadd.f32 %v291_v56, %v144_v55  ;;  %v292_v60 = vld [vmem:[#allocation5 + $0x348] sm:$0xff]  ;;  %v146_v61 = vld [vmem:[#allocation2 + $0x350] sm:$0xff]  ;;  %v293_v63 = vld [vmem:[#allocation5 + $0x350] sm:$0xff] }
  0x76   :  { %583 = vst [vmem:[#allocation7 + $0x330] sm:$0xff] %v436_v53  ;;  %v439_v62 = vadd.f32 %v292_v60, %v145_v59  ;;  %v147_v0 = vld [vmem:[#allocation2 + $0x358] sm:$0xff]  ;;  %v294_v1 = vld [vmem:[#allocation5 + $0x358] sm:$0xff]  ;;  %584 = vst [vmem:[#allocation7 + $0x338] sm:$0xff] %v437_v57  ;;  %v440_v2 = vadd.f32 %v293_v63, %v146_v61 }
  0x77   :  { %585 = vst [vmem:[#allocation7 + $0x340] sm:$0xff] %v438_v58  ;;  %v441_v3 = vadd.f32 %v294_v1, %v147_v0  ;;  %v148_v4 = vld [vmem:[#allocation2 + $0x360] sm:$0xff]  ;;  %v295_v5 = vld [vmem:[#allocation5 + $0x360] sm:$0xff]  ;;  %v149_v6 = vld [vmem:[#allocation2 + $0x368] sm:$0xff] }
  0x78   :  { %586 = vst [vmem:[#allocation7 + $0x348] sm:$0xff] %v439_v62  ;;  %v442_v7 = vadd.f32 %v295_v5, %v148_v4  ;;  %v296_v8 = vld [vmem:[#allocation5 + $0x368] sm:$0xff]  ;;  %v150_v9 = vld [vmem:[#allocation2 + $0x370] sm:$0xff]  ;;  %v297_v10 = vld [vmem:[#allocation5 + $0x370] sm:$0xff] }
  0x79   :  { %587 = vst [vmem:[#allocation7 + $0x350] sm:$0xff] %v440_v2  ;;  %588 = vst [vmem:[#allocation7 + $0x358] sm:$0xff] %v441_v3  ;;  %v443_v11 = vadd.f32 %v296_v8, %v149_v6  ;;  %v444_v12 = vadd.f32 %v297_v10, %v150_v9  ;;  %v151_v13 = vld [vmem:[#allocation2 + $0x378] sm:$0xff]  ;;  %v298_v14 = vld [vmem:[#allocation5 + $0x378] sm:$0xff] }
  0x7a   :  { %v152_v15 = vld [vmem:[#allocation2 + $0x380] sm:$0xff]  ;;  %589 = vst [vmem:[#allocation7 + $0x360] sm:$0xff] %v442_v7  ;;  %v445_v16 = vadd.f32 %v298_v14, %v151_v13  ;;  %v299_v17 = vld [vmem:[#allocation5 + $0x380] sm:$0xff]  ;;  %v153_v18 = vld [vmem:[#allocation2 + $0x388] sm:$0xff] }
  0x7b   :  { %v300_v19 = vld [vmem:[#allocation5 + $0x388] sm:$0xff]  ;;  %590 = vst [vmem:[#allocation7 + $0x368] sm:$0xff] %v443_v11  ;;  %591 = vst [vmem:[#allocation7 + $0x370] sm:$0xff] %v444_v12  ;;  %v446_v20 = vadd.f32 %v299_v17, %v152_v15  ;;  %v154_v22 = vld [vmem:[#allocation2 + $0x390] sm:$0xff] }
  0x7c   :  { %v447_v21 = vadd.f32 %v300_v19, %v153_v18  ;;  %v301_v23 = vld [vmem:[#allocation5 + $0x390] sm:$0xff]  ;;  %v155_v24 = vld [vmem:[#allocation2 + $0x398] sm:$0xff]  ;;  %592 = vst [vmem:[#allocation7 + $0x378] sm:$0xff] %v445_v16  ;;  %v302_v26 = vld [vmem:[#allocation5 + $0x398] sm:$0xff] }
  0x7d   :  { %v448_v25 = vadd.f32 %v301_v23, %v154_v22  ;;  %v156_v27 = vld [vmem:[#allocation2 + $0x3a0] sm:$0xff]  ;;  %v303_v28 = vld [vmem:[#allocation5 + $0x3a0] sm:$0xff]  ;;  %593 = vst [vmem:[#allocation7 + $0x380] sm:$0xff] %v446_v20  ;;  %v449_v29 = vadd.f32 %v302_v26, %v155_v24  ;;  %v157_v31 = vld [vmem:[#allocation2 + $0x3a8] sm:$0xff] }
  0x7e   :  { %594 = vst [vmem:[#allocation7 + $0x388] sm:$0xff] %v447_v21  ;;  %v450_v30 = vadd.f32 %v303_v28, %v156_v27  ;;  %v304_v32 = vld [vmem:[#allocation5 + $0x3a8] sm:$0xff]  ;;  %v158_v33 = vld [vmem:[#allocation2 + $0x3b0] sm:$0xff]  ;;  %v305_v35 = vld [vmem:[#allocation5 + $0x3b0] sm:$0xff] }
  0x7f   :  { %595 = vst [vmem:[#allocation7 + $0x390] sm:$0xff] %v448_v25  ;;  %v451_v34 = vadd.f32 %v304_v32, %v157_v31  ;;  %v159_v36 = vld [vmem:[#allocation2 + $0x3b8] sm:$0xff]  ;;  %v306_v37 = vld [vmem:[#allocation5 + $0x3b8] sm:$0xff]  ;;  %596 = vst [vmem:[#allocation7 + $0x398] sm:$0xff] %v449_v29  ;;  %v452_v38 = vadd.f32 %v305_v35, %v158_v33 }
  0x80   :  { %597 = vst [vmem:[#allocation7 + $0x3a0] sm:$0xff] %v450_v30  ;;  %v453_v39 = vadd.f32 %v306_v37, %v159_v36  ;;  %v160_v40 = vld [vmem:[#allocation2 + $0x3c0] sm:$0xff]  ;;  %v307_v41 = vld [vmem:[#allocation5 + $0x3c0] sm:$0xff]  ;;  %v161_v42 = vld [vmem:[#allocation2 + $0x3c8] sm:$0xff] }
  0x81   :  { %598 = vst [vmem:[#allocation7 + $0x3a8] sm:$0xff] %v451_v34  ;;  %v454_v43 = vadd.f32 %v307_v41, %v160_v40  ;;  %v308_v44 = vld [vmem:[#allocation5 + $0x3c8] sm:$0xff]  ;;  %v162_v45 = vld [vmem:[#allocation2 + $0x3d0] sm:$0xff]  ;;  %v309_v46 = vld [vmem:[#allocation5 + $0x3d0] sm:$0xff] }
  0x82   :  { %599 = vst [vmem:[#allocation7 + $0x3b0] sm:$0xff] %v452_v38  ;;  %600 = vst [vmem:[#allocation7 + $0x3b8] sm:$0xff] %v453_v39  ;;  %v455_v47 = vadd.f32 %v308_v44, %v161_v42  ;;  %v456_v48 = vadd.f32 %v309_v46, %v162_v45  ;;  %v163_v49 = vld [vmem:[#allocation2 + $0x3d8] sm:$0xff]  ;;  %v310_v50 = vld [vmem:[#allocation5 + $0x3d8] sm:$0xff] }
  0x83   :  { %v164_v51 = vld [vmem:[#allocation2 + $0x3e0] sm:$0xff]  ;;  %601 = vst [vmem:[#allocation7 + $0x3c0] sm:$0xff] %v454_v43  ;;  %v457_v52 = vadd.f32 %v310_v50, %v163_v49  ;;  %v311_v53 = vld [vmem:[#allocation5 + $0x3e0] sm:$0xff]  ;;  %v165_v54 = vld [vmem:[#allocation2 + $0x3e8] sm:$0xff] }
  0x84   :  { %v312_v55 = vld [vmem:[#allocation5 + $0x3e8] sm:$0xff]  ;;  %602 = vst [vmem:[#allocation7 + $0x3c8] sm:$0xff] %v455_v47  ;;  %603 = vst [vmem:[#allocation7 + $0x3d0] sm:$0xff] %v456_v48  ;;  %v458_v56 = vadd.f32 %v311_v53, %v164_v51  ;;  %v166_v58 = vld [vmem:[#allocation2 + $0x3f0] sm:$0xff] }
  0x85   :  { %v459_v57 = vadd.f32 %v312_v55, %v165_v54  ;;  %v313_v59 = vld [vmem:[#allocation5 + $0x3f0] sm:$0xff]  ;;  %v167_v60 = vld [vmem:[#allocation2 + $0x3f8] sm:$0xff]  ;;  %604 = vst [vmem:[#allocation7 + $0x3d8] sm:$0xff] %v457_v52  ;;  %v314_v62 = vld [vmem:[#allocation5 + $0x3f8] sm:$0xff] }
  0x86   :  { %v460_v61 = vadd.f32 %v313_v59, %v166_v58  ;;  %v168_v63 = vld [vmem:[#allocation2 + $0x400] sm:$0xff]  ;;  %v315_v0 = vld [vmem:[#allocation5 + $0x400] sm:$0xff]  ;;  %605 = vst [vmem:[#allocation7 + $0x3e0] sm:$0xff] %v458_v56  ;;  %v461_v1 = vadd.f32 %v314_v62, %v167_v60  ;;  %v169_v3 = vld [vmem:[#allocation2 + $0x408] sm:$0xff] }
  0x87   :  { %606 = vst [vmem:[#allocation7 + $0x3e8] sm:$0xff] %v459_v57  ;;  %v462_v2 = vadd.f32 %v315_v0, %v168_v63  ;;  %v316_v4 = vld [vmem:[#allocation5 + $0x408] sm:$0xff]  ;;  %v170_v5 = vld [vmem:[#allocation2 + $0x410] sm:$0xff]  ;;  %v317_v7 = vld [vmem:[#allocation5 + $0x410] sm:$0xff] }
  0x88   :  { %607 = vst [vmem:[#allocation7 + $0x3f0] sm:$0xff] %v460_v61  ;;  %v463_v6 = vadd.f32 %v316_v4, %v169_v3  ;;  %v171_v8 = vld [vmem:[#allocation2 + $0x418] sm:$0xff]  ;;  %v318_v9 = vld [vmem:[#allocation5 + $0x418] sm:$0xff]  ;;  %608 = vst [vmem:[#allocation7 + $0x3f8] sm:$0xff] %v461_v1  ;;  %v464_v10 = vadd.f32 %v317_v7, %v170_v5 }
  0x89   :  { %609 = vst [vmem:[#allocation7 + $0x400] sm:$0xff] %v462_v2  ;;  %v465_v11 = vadd.f32 %v318_v9, %v171_v8  ;;  %v172_v12 = vld [vmem:[#allocation2 + $0x420] sm:$0xff]  ;;  %v319_v13 = vld [vmem:[#allocation5 + $0x420] sm:$0xff]  ;;  %v173_v14 = vld [vmem:[#allocation2 + $0x428] sm:$0xff] }
  0x8a   :  { %610 = vst [vmem:[#allocation7 + $0x408] sm:$0xff] %v463_v6  ;;  %v466_v15 = vadd.f32 %v319_v13, %v172_v12  ;;  %v320_v16 = vld [vmem:[#allocation5 + $0x428] sm:$0xff]  ;;  %v174_v17 = vld [vmem:[#allocation2 + $0x430] sm:$0xff]  ;;  %v321_v18 = vld [vmem:[#allocation5 + $0x430] sm:$0xff] }
  0x8b   :  { %611 = vst [vmem:[#allocation7 + $0x410] sm:$0xff] %v464_v10  ;;  %612 = vst [vmem:[#allocation7 + $0x418] sm:$0xff] %v465_v11  ;;  %v467_v19 = vadd.f32 %v320_v16, %v173_v14  ;;  %v468_v20 = vadd.f32 %v321_v18, %v174_v17  ;;  %v175_v21 = vld [vmem:[#allocation2 + $0x438] sm:$0xff]  ;;  %v322_v22 = vld [vmem:[#allocation5 + $0x438] sm:$0xff] }
  0x8c   :  { %v176_v23 = vld [vmem:[#allocation2 + $0x440] sm:$0xff]  ;;  %613 = vst [vmem:[#allocation7 + $0x420] sm:$0xff] %v466_v15  ;;  %v469_v24 = vadd.f32 %v322_v22, %v175_v21  ;;  %v323_v25 = vld [vmem:[#allocation5 + $0x440] sm:$0xff]  ;;  %v177_v26 = vld [vmem:[#allocation2 + $0x448] sm:$0xff] }
  0x8d   :  { %v324_v27 = vld [vmem:[#allocation5 + $0x448] sm:$0xff]  ;;  %614 = vst [vmem:[#allocation7 + $0x428] sm:$0xff] %v467_v19  ;;  %615 = vst [vmem:[#allocation7 + $0x430] sm:$0xff] %v468_v20  ;;  %v470_v28 = vadd.f32 %v323_v25, %v176_v23  ;;  %v178_v30 = vld [vmem:[#allocation2 + $0x450] sm:$0xff] }
  0x8e   :  { %v471_v29 = vadd.f32 %v324_v27, %v177_v26  ;;  %v325_v31 = vld [vmem:[#allocation5 + $0x450] sm:$0xff]  ;;  %v179_v32 = vld [vmem:[#allocation2 + $0x458] sm:$0xff]  ;;  %616 = vst [vmem:[#allocation7 + $0x438] sm:$0xff] %v469_v24  ;;  %v326_v34 = vld [vmem:[#allocation5 + $0x458] sm:$0xff] }
  0x8f   :  { %v472_v33 = vadd.f32 %v325_v31, %v178_v30  ;;  %v180_v35 = vld [vmem:[#allocation2 + $0x460] sm:$0xff]  ;;  %v327_v36 = vld [vmem:[#allocation5 + $0x460] sm:$0xff]  ;;  %617 = vst [vmem:[#allocation7 + $0x440] sm:$0xff] %v470_v28  ;;  %v473_v37 = vadd.f32 %v326_v34, %v179_v32  ;;  %v181_v39 = vld [vmem:[#allocation2 + $0x468] sm:$0xff] }
  0x90   :  { %618 = vst [vmem:[#allocation7 + $0x448] sm:$0xff] %v471_v29  ;;  %v474_v38 = vadd.f32 %v327_v36, %v180_v35  ;;  %v328_v40 = vld [vmem:[#allocation5 + $0x468] sm:$0xff]  ;;  %v182_v41 = vld [vmem:[#allocation2 + $0x470] sm:$0xff]  ;;  %v329_v43 = vld [vmem:[#allocation5 + $0x470] sm:$0xff] }
  0x91   :  { %619 = vst [vmem:[#allocation7 + $0x450] sm:$0xff] %v472_v33  ;;  %v475_v42 = vadd.f32 %v328_v40, %v181_v39  ;;  %v183_v44 = vld [vmem:[#allocation2 + $0x478] sm:$0xff]  ;;  %v330_v45 = vld [vmem:[#allocation5 + $0x478] sm:$0xff]  ;;  %620 = vst [vmem:[#allocation7 + $0x458] sm:$0xff] %v473_v37  ;;  %v476_v46 = vadd.f32 %v329_v43, %v182_v41 }
  0x92   :  { %621 = vst [vmem:[#allocation7 + $0x460] sm:$0xff] %v474_v38  ;;  %v477_v47 = vadd.f32 %v330_v45, %v183_v44  ;;  %v184_v48 = vld [vmem:[#allocation2 + $0x480] sm:$0xff]  ;;  %v331_v49 = vld [vmem:[#allocation5 + $0x480] sm:$0xff]  ;;  %v185_v50 = vld [vmem:[#allocation2 + $0x488] sm:$0xff] }
  0x93   :  { %622 = vst [vmem:[#allocation7 + $0x468] sm:$0xff] %v475_v42  ;;  %v478_v51 = vadd.f32 %v331_v49, %v184_v48  ;;  %v332_v52 = vld [vmem:[#allocation5 + $0x488] sm:$0xff]  ;;  %v186_v53 = vld [vmem:[#allocation2 + $0x490] sm:$0xff]  ;;  %v333_v54 = vld [vmem:[#allocation5 + $0x490] sm:$0xff] }
  0x94   :  { %623 = vst [vmem:[#allocation7 + $0x470] sm:$0xff] %v476_v46  ;;  %624 = vst [vmem:[#allocation7 + $0x478] sm:$0xff] %v477_v47  ;;  %v479_v55 = vadd.f32 %v332_v52, %v185_v50  ;;  %v480_v56 = vadd.f32 %v333_v54, %v186_v53 }
  0x95   :  { %625 = vst [vmem:[#allocation7 + $0x480] sm:$0xff] %v478_v51 }
  0x96   :  { %626 = vst [vmem:[#allocation7 + $0x488] sm:$0xff] %v479_v55  ;;  %627 = vst [vmem:[#allocation7 + $0x490] sm:$0xff] %v480_v56 }
  0x97   :  { %706 = shalt.err (!%p703_p6)
}
  0x98   :  { %s707_s10 = scalar_lea.hbm %s790_s2, 18816 }
  0x99   :  { %p708_p7 = scmp.ne.s32.totalorder %s790_s2, %s707_s10  ;;  %p711_p8 = scmp.lt.u32.totalorder %s707_s10, %s790_s2 }
  0x9b   :  { %p713_p9 = pnand %p711_p8, %p708_p7 }
  0x9d   :  { %716 = shalt.err (!%p713_p9)
}
  0x9e   :  { %639 = dma.vmem_to_hbm [thread:$0]  %s634_s6, 18816, %s790_s2, [#allocation4], %s724_s19, %s724_s19, %s725_s20  }
  0x9f   :  { %721 = dma.done.wait [#allocation4], 18816  }
  0xa0   :  { %722 = vsyncadd [#allocation4], 4294948480 }
  0xa1   :  { %643 = vsyncpa [#allocation3], 1 }
  0xa2   :  { %644 = vsyncpa [#allocation6], 1 }
  0xa3   :  { %645 = vsyncpa [#allocation4], 1 }

</bundles_post_ra>
